<compile_context>
chip_gen: v7x
topology: tpu7x:2x2x1
jax: 0.10.0
libtpu: 0.0.40
codegen_flags: <defaults>
</compile_context>

<pallas_src>
import functools

import jax
import jax.numpy as jnp
from jax.experimental import pallas as pl
from jax.experimental.pallas import tpu as pltpu

_LANE = 128
_MASK_VAL = -1.0e30   # fill for non-edges (strictly more negative than _M_INIT)
_M_INIT = -1.0e28     # running-max init: exp(_MASK_VAL - _M_INIT) underflows to 0,
                      # so fully-masked source blocks contribute nothing.


# ----------------------------- device heuristics -----------------------------
def _device_info():
  kind = ""
  try:
    kind = jax.devices()[0].device_kind.lower()
  except Exception:
    pass
  vmem = None
  try:
    info = pltpu.get_tpu_info()
    for name in ("vmem_capacity_bytes", "vmem_size_bytes", "vmem_bytes"):
      v = getattr(info, name, None)
      if v:
        vmem = int(v)
        break
  except Exception:
    pass
  if vmem is None:
    vmem = (64 << 20) if "v7" in kind else (128 << 20)
  return kind, vmem


def _fit_tile(n_padded, want):
  """Largest multiple of 128 <= want that divides n_padded (n_padded % 128 == 0)."""
  t = min(want, n_padded)
  while n_padded % t:
    t -= _LANE
  return t


def _pad_rows(a, n_padded):
  n = a.shape[0]
  if n == n_padded:
    return a
  return jnp.pad(a, [(0, n_padded - n)] + [(0, 0)] * (a.ndim - 1))


# ------------------------------- host-side prep ------------------------------
# TODO(synk): hoist prepare_params / prepare_adj out of attention_layer when the
# layer is applied repeatedly with fixed weights / a static graph.
def prepare_params(params, n_heads):
  E = params["w_fc"].shape[0]
  D = E // n_heads
  w_r = params["w_fc"].reshape(E, n_heads, D)
  wl = jnp.einsum("ehd,hd->eh", w_r, params["attn_l"])     # [E, H]
  wr = jnp.einsum("ehd,hd->eh", w_r, params["attn_r"])     # [E, H]
  return dict(
      w_cat=jnp.concatenate([params["w_fc"], wr], axis=1).astype(jnp.bfloat16),
      wl_t=wl.T.astype(jnp.bfloat16),                      # [H, E]
      b_gat=params["b_gat"],
      bn1_g=params["bn1_g"], bn1_b=params["bn1_b"],
      w1=params["w1"].astype(jnp.bfloat16), b1=params["b1"],
      w2=params["w2"].astype(jnp.bfloat16), b2=params["b2"],
      bn2_g=params["bn2_g"], bn2_b=params["bn2_b"],
  )


def prepare_adj(adj, n_padded):
  n = adj.shape[0]
  a = jnp.zeros((n_padded, n_padded), jnp.int8).at[:n, :n].set(
      (adj > 0).astype(jnp.int8))
  if n_padded > n:
    idx = jnp.arange(n, n_padded)
    a = a.at[idx, idx].set(1)        # self-loops on padded rows: denom stays > 0
  return a


# ----------------------------- kernel 1: projection ---------------------------
def _project_kernel(x_ref, wcat_ref, wlt_ref, feat_ref, er_ref, elt_ref,
                    *, embed_dim):
  xb = x_ref[...].astype(jnp.bfloat16)                             # [tp, E]
  y = jnp.dot(xb, wcat_ref[...], preferred_element_type=jnp.float32)  # [tp, E+H]
  feat_ref[...] = y[:, :embed_dim].astype(jnp.bfloat16)
  er_ref[...] = y[:, embed_dim:]                                   # [tp, H]
  # el^T emitted directly as [H, tp] (lane-dense store, no host-side transpose):
  # contract over E of both operands (same pattern as q @ k^T in attention).
  elt_ref[...] = jax.lax.dot_general(
      wlt_ref[...], xb, (((1,), (1,)), ((), ())),
      preferred_element_type=jnp.float32)                          # [H, tp]


# ------------------- kernel 2: GAT (flash-style over src tiles) ---------------
def _gat_kernel(adj_ref, x_ref, er_ref, elt_ref, feat_ref, bg_ref, h1_ref,
                m_sc, l_sc, acc_sc, *, n_heads, head_dim, negative_slope,
                exp_dtype):
  k = pl.program_id(1)

  @pl.when(k == 0)
  def _():
    m_sc[...] = jnp.full_like(m_sc, _M_INIT)
    l_sc[...] = jnp.zeros_like(l_sc)
    acc_sc[...] = jnp.zeros_like(acc_sc)

  mask = adj_ref[...] > 0                                   # [tm, tk] (int8 in)
  feat = feat_ref[...]                                      # [tk, E]  bf16
  er = er_ref[...]                                          # [tm, H]  f32
  elt = elt_ref[...]                                        # [H, tk]  f32

  for h in range(n_heads):                                  # static unroll
    sl = slice(h * head_dim, (h + 1) * head_dim)
    s = er[:, h:h + 1] + elt[h:h + 1, :]                    # [tm, tk]
    s = jnp.maximum(s, negative_slope * s)                  # LeakyReLU (mul+max)
    s = jnp.where(mask, s, _MASK_VAL)
    m_prev = m_sc[:, h:h + 1]
    m_new = jnp.maximum(m_prev, jnp.max(s, axis=-1, keepdims=True))
    corr = jnp.exp(m_prev - m_new)                          # [tm, 1] f32
    p = jnp.exp((s - m_new).astype(exp_dtype))              # bf16 exp on v6e/v7x
    l_sc[:, h:h + 1] = corr * l_sc[:, h:h + 1] + jnp.sum(
        p.astype(jnp.float32), axis=-1, keepdims=True)
    m_sc[:, h:h + 1] = m_new
    acc_sc[:, sl] = corr * acc_sc[:, sl] + jnp.dot(
        p.astype(jnp.bfloat16), feat[:, sl],
        preferred_element_type=jnp.float32)                 # [tm, D]

  @pl.when(k == pl.num_programs(1) - 1)
  def _():
    for h in range(n_heads):
      sl = slice(h * head_dim, (h + 1) * head_dim)
      inv = pl.reciprocal(l_sc[:, h:h + 1], approx=True)    # EUP divide
      acc_sc[:, sl] = acc_sc[:, sl] * inv
    # TODO(synk): with E=32 this store is only 32/128 lanes; batch several
    # graphs per call (or grow head_dim) to lane-densify it.
    h1_ref[...] = x_ref[...] + acc_sc[...] + bg_ref[...]    # SkipConnection


# ---------------- kernel 3a/3c: two-pass BatchNorm statistics -----------------
def _bn_stats_kernel(h_ref, mean_ref, rstd_ref, acc_sc, mean_sc, *, n_valid, eps):
  phase = pl.program_id(0)          # 0: sum -> mean, 1: centered sum of squares
  t = pl.program_id(1)
  tm = h_ref.shape[0]
  row = jax.lax.broadcasted_iota(jnp.int32, (tm, 1), 0) + t * tm
  valid = row < n_valid             # mask padded rows out of the statistics
  inv_n = 1.0 / n_valid

  @pl.when(jnp.logical_and(phase == 0, t == 0))
  def _():
    acc_sc[...] = jnp.zeros_like(acc_sc)

  @pl.when(phase == 0)
  def _():
    acc_sc[...] += jnp.sum(jnp.where(valid, h_ref[...], 0.0),
                           axis=0, keepdims=True)

  @pl.when(jnp.logical_and(phase == 1, t == 0))
  def _():
    mean_sc[...] = acc_sc[...] * inv_n
    acc_sc[...] = jnp.zeros_like(acc_sc)

  @pl.when(phase == 1)
  def _():
    d = jnp.where(valid, h_ref[...] - mean_sc[...], 0.0)
    acc_sc[...] += jnp.sum(d * d, axis=0, keepdims=True)

  @pl.when(jnp.logical_and(phase == 1, t == pl.num_programs(1) - 1))
  def _():
    mean_ref[...] = mean_sc[...]
    rstd_ref[...] = jax.lax.rsqrt(acc_sc[...] * inv_n + eps)


# --------------------- kernel 3b: BN1 -> Linear/ReLU/Linear (+skip) -----------
def _ffn_kernel(h1_ref, mean_ref, rstd_ref, g_ref, b_ref, w1_ref, b1_ref,
                w2_ref, b2_ref, h3_ref):
  h2 = (h1_ref[...] - mean_ref[...]) * rstd_ref[...] * g_ref[...] + b_ref[...]
  z = jnp.dot(h2.astype(jnp.bfloat16), w1_ref[...],
              preferred_element_type=jnp.float32) + b1_ref[...]
  z = jnp.maximum(z, 0.0)
  z = jnp.dot(z.astype(jnp.bfloat16), w2_ref[...],
              preferred_element_type=jnp.float32) + b2_ref[...]
  h3_ref[...] = h2 + z


# ------------------------------ kernel 3d: BN2 apply --------------------------
def _bn_apply_kernel(h_ref, mean_ref, rstd_ref, g_ref, b_ref, out_ref):
  out_ref[...] = (h_ref[...] - mean_ref[...]) * rstd_ref[...] * g_ref[...] \
      + b_ref[...]


# ----------------------------------- wrapper ----------------------------------
def attention_layer(x, adj, params, *, n_heads, eps=1e-5):
  """Pallas implementation of AttentionLayer.forward(G, x)."""
  N, E = x.shape
  H = n_heads
  D = E // H
  hidden = params["w1"].shape[1]

  kind, vmem_phys = _device_info()
  vmem_limit = int(max(32 << 20, min(vmem_phys - (16 << 20), 112 << 20)))
  is_v5 = ("v5" in kind) or ("v4" in kind)
  exp_dtype = jnp.bfloat16 if (("v6" in kind) or ("v7" in kind)) else jnp.float32

  Np = ((N + _LANE - 1) // _LANE) * _LANE
  tg = _fit_tile(Np, 128 if is_v5 else 256)   # GAT dst/src tile
  tp = _fit_tile(Np, 512)                     # projection row tile (decoupled)
  tf = _fit_tile(Np, 256 if is_v5 else 512)   # feed-forward row tile

  prep = prepare_params(params, n_heads)
  adj_i8 = prepare_adj(adj, Np)
  x_p = _pad_rows(x, Np)

  def cp(sem):
    return pltpu.CompilerParams(dimension_semantics=sem,
                                vmem_limit_bytes=vmem_limit)

  # ---- 1) fused projection: feat (bf16), er, el^T ----
  proj = functools.partial(_project_kernel, embed_dim=E)
  feat, er, el_t = pl.pallas_call(
      proj,
      out_shape=(jax.ShapeDtypeStruct((Np, E), jnp.bfloat16),
                 jax.ShapeDtypeStruct((Np, H), jnp.float32),
                 jax.ShapeDtypeStruct((H, Np), jnp.float32)),
      grid_spec=pltpu.PrefetchScalarGridSpec(
          num_scalar_prefetch=0, grid=(Np // tp,),
          in_specs=[pl.BlockSpec((tp, E), lambda i: (i, 0)),
                    pl.BlockSpec((E, E + H), lambda i: (0, 0)),
                    pl.BlockSpec((H, E), lambda i: (0, 0))],
          out_specs=[pl.BlockSpec((tp, E), lambda i: (i, 0)),
                     pl.BlockSpec((tp, H), lambda i: (i, 0)),
                     pl.BlockSpec((H, tp), lambda i: (0, i))]),
      compiler_params=cp(("parallel",)),
  )(x_p, prep["w_cat"], prep["wl_t"])

  # ---- 2) GAT aggregation + skip: online softmax over source tiles ----
  gat = functools.partial(_gat_kernel, n_heads=H, head_dim=D,
                          negative_slope=0.2, exp_dtype=exp_dtype)
  h1 = pl.pallas_call(
      gat,
      out_shape=jax.ShapeDtypeStruct((Np, E), jnp.float32),
      grid_spec=pltpu.PrefetchScalarGridSpec(
          num_scalar_prefetch=0, grid=(Np // tg, Np // tg),
          in_specs=[pl.BlockSpec((tg, tg), lambda i, k: (i, k)),   # adj int8
                    pl.BlockSpec((tg, E), lambda i, k: (i, 0)),    # x   (dst)
                    pl.BlockSpec((tg, H), lambda i, k: (i, 0)),    # er  (dst)
                    pl.BlockSpec((H, tg), lambda i, k: (0, k)),    # el^T (src)
                    pl.BlockSpec((tg, E), lambda i, k: (k, 0)),    # feat (src)
                    pl.BlockSpec((1, E), lambda i, k: (0, 0))],    # GAT bias
          out_specs=pl.BlockSpec((tg, E), lambda i, k: (i, 0)),
          scratch_shapes=[pltpu.VMEM((tg, H), jnp.float32),        # m
                          pltpu.VMEM((tg, H), jnp.float32),        # l
                          pltpu.VMEM((tg, E), jnp.float32)]),      # acc
      compiler_params=cp(("parallel", "arbitrary")),
  )(adj_i8, x_p, er, el_t, feat, prep["b_gat"])

  # ---- 3) feed-forward: two-pass BN stats -> BN1+FFN(+skip) -> BN2 ----
  def bn_stats(h):
    k = functools.partial(_bn_stats_kernel, n_valid=N, eps=eps)
    return pl.pallas_call(
        k,
        out_shape=(jax.ShapeDtypeStruct((1, E), jnp.float32),
                   jax.ShapeDtypeStruct((1, E), jnp.float32)),
        grid_spec=pltpu.PrefetchScalarGridSpec(
            num_scalar_prefetch=0, grid=(2, Np // tf),
            in_specs=[pl.BlockSpec((tf, E), lambda p, t: (t, 0))],
            out_specs=[pl.BlockSpec((1, E), lambda p, t: (0, 0)),
                       pl.BlockSpec((1, E), lambda p, t: (0, 0))],
            scratch_shapes=[pltpu.VMEM((1, E), jnp.float32),
                            pltpu.VMEM((1, E), jnp.float32)]),
        compiler_params=cp(("arbitrary", "arbitrary")),
    )(h)

  mean1, rstd1 = bn_stats(h1)

  def const(shape):
    return pl.BlockSpec(shape, lambda i: (0, 0))

  h3 = pl.pallas_call(
      _ffn_kernel,
      out_shape=jax.ShapeDtypeStruct((Np, E), jnp.float32),
      grid_spec=pltpu.PrefetchScalarGridSpec(
          num_scalar_prefetch=0, grid=(Np // tf,),
          in_specs=[pl.BlockSpec((tf, E), lambda i: (i, 0)),
                    const((1, E)), const((1, E)), const((1, E)), const((1, E)),
                    const((E, hidden)), const((1, hidden)),
                    const((hidden, E)), const((1, E))],
          out_specs=pl.BlockSpec((tf, E), lambda i: (i, 0))),
      compiler_params=cp(("parallel",)),
  )(h1, mean1, rstd1, prep["bn1_g"], prep["bn1_b"],
    prep["w1"], prep["b1"], prep["w2"], prep["b2"])

  mean2, rstd2 = bn_stats(h3)

  out = pl.pallas_call(
      _bn_apply_kernel,
      out_shape=jax.ShapeDtypeStruct((Np, E), jnp.float32),
      grid_spec=pltpu.PrefetchScalarGridSpec(
          num_scalar_prefetch=0, grid=(Np // tf,),
          in_specs=[pl.BlockSpec((tf, E), lambda i: (i, 0)),
                    const((1, E)), const((1, E)), const((1, E)), const((1, E))],
          out_specs=pl.BlockSpec((tf, E), lambda i: (i, 0))),
      compiler_params=cp(("parallel",)),
  )(h3, mean2, rstd2, prep["bn2_g"], prep["bn2_b"])

  return out[:N]


# ------------------------------ pure-JAX reference ----------------------------
def reference(x, adj, params, n_heads):
  """Pure-JAX reference mirroring DGL GATConv + the torch feed-forward."""
  N, E = x.shape
  D = E // n_heads
  feat = (x @ params["w_fc"]).reshape(N, n_heads, D)
  el = jnp.einsum("nhd,hd->nh", feat, params["attn_l"])
  er = jnp.einsum("nhd,hd->nh", feat, params["attn_r"])
  s = el[None, :, :] + er[:, None, :]                  # [dst, src, h]
  s = jnp.where(s > 0, s, 0.2 * s)
  mask = (adj > 0)[:, :, None]
  s = jnp.where(mask, s, -jnp.inf)
  alpha = jax.nn.softmax(s, axis=1)
  alpha = jnp.where(mask, alpha, 0.0)
  gat = jnp.einsum("dsh,shk->dhk", alpha, feat).reshape(N, E) + params["b_gat"]
  h1 = x + gat

  def bn(h, g, b):
    m = h.mean(0, keepdims=True)
    v = ((h - m) ** 2).mean(0, keepdims=True)
    return (h - m) / jnp.sqrt(v + 1e-5) * g + b

  h2 = bn(h1, params["bn1_g"], params["bn1_b"])
  z = jnp.maximum(h2 @ params["w1"] + params["b1"], 0.0) @ params["w2"] + params["b2"]
  h3 = h2 + z
  return bn(h3, params["bn2_g"], params["bn2_b"])


if __name__ == "__main__":
  N = 8            # number of graph nodes
  embed_dim = 32
  n_heads = 4
  hidden_dim = 64
  D = embed_dim // n_heads

  key = jax.random.PRNGKey(0)
  ks = jax.random.split(key, 12)
  params = {
      "w_fc":   0.2 * jax.random.normal(ks[0], (embed_dim, embed_dim), jnp.float32),
      "attn_l": 0.2 * jax.random.normal(ks[1], (n_heads, D), jnp.float32),
      "attn_r": 0.2 * jax.random.normal(ks[2], (n_heads, D), jnp.float32),
      "b_gat":  0.1 * jax.random.normal(ks[3], (1, embed_dim), jnp.float32),
      "bn1_g":  1.0 + 0.1 * jax.random.normal(ks[4], (1, embed_dim), jnp.float32),
      "bn1_b":  0.1 * jax.random.normal(ks[5], (1, embed_dim), jnp.float32),
      "w1":     0.2 * jax.random.normal(ks[6], (embed_dim, hidden_dim), jnp.float32),
      "b1":     0.1 * jax.random.normal(ks[7], (1, hidden_dim), jnp.float32),
      "w2":     0.2 * jax.random.normal(ks[8], (hidden_dim, embed_dim), jnp.float32),
      "b2":     0.1 * jax.random.normal(ks[9], (1, embed_dim), jnp.float32),
      "bn2_g":  1.0 + 0.1 * jax.random.normal(ks[10], (1, embed_dim), jnp.float32),
      "bn2_b":  0.1 * jax.random.normal(ks[11], (1, embed_dim), jnp.float32),
  }

  x = jax.random.normal(jax.random.PRNGKey(42), (N, embed_dim), jnp.float32)

  # deterministic graph: bidirectional ring + self-loops, adj[dst, src]
  idx = jnp.arange(N)
  adj = jnp.zeros((N, N), jnp.float32)
  adj = adj.at[idx, idx].set(1.0)
  adj = adj.at[(idx + 1) % N, idx].set(1.0)
  adj = adj.at[(idx - 1) % N, idx].set(1.0)

  out = jax.block_until_ready(attention_layer(x, adj, params, n_heads=n_heads))
  ref = reference(x, adj, params, n_heads)
  assert out.shape == (N, embed_dim)
  # bf16 MXU operands + bf16 exp (v6e/v7x) + approx reciprocal -> bf16 tolerance.
  assert jnp.allclose(out, ref, atol=5e-2, rtol=5e-2), "mismatch vs JAX reference"
  print("KERNEL_OK")
</pallas_src>

<mosaic_0001>
module attributes {stable_mosaic.version = 11 : i64} {
  func.func @_project_kernel(%arg0: i32, %arg1: memref<128x32xf32, #tpu.memory_space<vmem>>, %arg2: memref<32x36xbf16, #tpu.memory_space<vmem>>, %arg3: memref<4x32xbf16, #tpu.memory_space<vmem>>, %arg4: memref<128x32xbf16, #tpu.memory_space<vmem>>, %arg5: memref<128x4xf32, #tpu.memory_space<vmem>>, %arg6: memref<4x128xf32, #tpu.memory_space<vmem>>) attributes {dimension_semantics = [#tpu.dimension_semantics<parallel>], iteration_bounds = array<i64: 1>, scalar_prefetch = 0 : i64, scratch_operands = 0 : i64, tpu.core_type = #tpu.core_type<tc>, window_params = [{transform_indices = @transform_0, window_bounds = array<i64: 128, 32>}, {pipeline_mode = #tpu.pipeline_mode<synchronous>, transform_indices = @transform_1, window_bounds = array<i64: 32, 36>}, {pipeline_mode = #tpu.pipeline_mode<synchronous>, transform_indices = @transform_2, window_bounds = array<i64: 4, 32>}, {transform_indices = @transform_3, window_bounds = array<i64: 128, 32>}, {transform_indices = @transform_4, window_bounds = array<i64: 128, 4>}, {transform_indices = @transform_5, window_bounds = array<i64: 4, 128>}]} {
    %c0 = arith.constant 0 : index
    %c0_0 = arith.constant 0 : index
    %0 = vector.load %arg1[%c0, %c0_0] : memref<128x32xf32, #tpu.memory_space<vmem>>, vector<128x32xf32>
    %1 = arith.truncf %0 : vector<128x32xf32> to vector<128x32xbf16>
    %c0_1 = arith.constant 0 : index
    %c0_2 = arith.constant 0 : index
    %2 = vector.load %arg2[%c0_1, %c0_2] : memref<32x36xbf16, #tpu.memory_space<vmem>>, vector<32x36xbf16>
    %cst = arith.constant dense<0.000000e+00> : vector<128x36xf32>
    %3 = tpu.matmul %1, %2, %cst {dimension_numbers = #tpu.dot_dimension_numbers<[1], [0], [0], [1], [0, 0, 1, 1], [], []>} : vector<128x32xbf16>, vector<32x36xbf16>, vector<128x36xf32> -> vector<128x36xf32>
    %4 = vector.extract_strided_slice %3 {offsets = [0, 0], sizes = [128, 32], strides = [1, 1]} : vector<128x36xf32> to vector<128x32xf32>
    %5 = arith.truncf %4 : vector<128x32xf32> to vector<128x32xbf16>
    %c0_3 = arith.constant 0 : index
    %c0_4 = arith.constant 0 : index
    %6 = vector.load %arg4[%c0_3, %c0_4] : memref<128x32xbf16, #tpu.memory_space<vmem>>, vector<128x32xbf16>
    tpu.vector_store %arg4[%c0_3, %c0_4], %5 {strides = array<i32>} : memref<128x32xbf16, #tpu.memory_space<vmem>>, vector<128x32xbf16>,
    %7 = vector.extract_strided_slice %3 {offsets = [0, 32], sizes = [128, 4], strides = [1, 1]} : vector<128x36xf32> to vector<128x4xf32>
    %c0_5 = arith.constant 0 : index
    %c0_6 = arith.constant 0 : index
    %8 = vector.load %arg5[%c0_5, %c0_6] : memref<128x4xf32, #tpu.memory_space<vmem>>, vector<128x4xf32>
    tpu.vector_store %arg5[%c0_5, %c0_6], %7 {strides = array<i32>} : memref<128x4xf32, #tpu.memory_space<vmem>>, vector<128x4xf32>,
    %c0_7 = arith.constant 0 : index
    %c0_8 = arith.constant 0 : index
    %9 = vector.load %arg3[%c0_7, %c0_8] : memref<4x32xbf16, #tpu.memory_space<vmem>>, vector<4x32xbf16>
    %cst_9 = arith.constant dense<0.000000e+00> : vector<4x128xf32>
    %10 = tpu.matmul %9, %1, %cst_9 {dimension_numbers = #tpu.dot_dimension_numbers<[1], [1], [0], [0], [0, 0, 1, 0], [], []>} : vector<4x32xbf16>, vector<128x32xbf16>, vector<4x128xf32> -> vector<4x128xf32>
    %c0_10 = arith.constant 0 : index
    %c0_11 = arith.constant 0 : index
    %11 = vector.load %arg6[%c0_10, %c0_11] : memref<4x128xf32, #tpu.memory_space<vmem>>, vector<4x128xf32>
    tpu.vector_store %arg6[%c0_10, %c0_11], %10 {strides = array<i32>} : memref<4x128xf32, #tpu.memory_space<vmem>>, vector<4x128xf32>,
    return
  }
  func.func @transform_0(%arg0: i32) -> (i32, i32) {
    %c0_i32 = arith.constant 0 : i32
    %c0_i32_0 = arith.constant 0 : i32
    return %arg0, %c0_i32 : i32, i32
  }
  func.func @transform_1(%arg0: i32) -> (i32, i32) {
    %c0_i32 = arith.constant 0 : i32
    %c0_i32_0 = arith.constant 0 : i32
    %c0_i32_1 = arith.constant 0 : i32
    return %c0_i32, %c0_i32_0 : i32, i32
  }
  func.func @transform_2(%arg0: i32) -> (i32, i32) {
    %c0_i32 = arith.constant 0 : i32
    %c0_i32_0 = arith.constant 0 : i32
    %c0_i32_1 = arith.constant 0 : i32
    return %c0_i32, %c0_i32_0 : i32, i32
  }
  func.func @transform_3(%arg0: i32) -> (i32, i32) {
    %c0_i32 = arith.constant 0 : i32
    %c0_i32_0 = arith.constant 0 : i32
    return %arg0, %c0_i32 : i32, i32
  }
  func.func @transform_4(%arg0: i32) -> (i32, i32) {
    %c0_i32 = arith.constant 0 : i32
    %c0_i32_0 = arith.constant 0 : i32
    return %arg0, %c0_i32 : i32, i32
  }
  func.func @transform_5(%arg0: i32) -> (i32, i32) {
    %c0_i32 = arith.constant 0 : i32
    %c0_i32_0 = arith.constant 0 : i32
    return %c0_i32, %arg0 : i32, i32
  }
}

</mosaic_0001>

<bundles_post_ra>
// kernel: tpu_custom_call.1
= control target key start
LH: loop header
LB: loop body
LE: loop exit
PB: predicated region body
PF: predicated region fallthrough
CT: control target
= control target key end

     0   :  { %11 = vsyncpa [#allocation3], 0  ;;  %s924_s0 = inlined_call_operand.hbm [shape: f32[128,32], index: 0, kind: input, shape index: {}]   ;;  %s925_s1 = inlined_call_operand.hbm [shape: bf16[32,36], index: 1, kind: input, shape index: {}]   ;;  %s926_s2 = inlined_call_operand.hbm [shape: bf16[4,32], index: 2, kind: input, shape index: {}]   ;;  %s927_s3 = inlined_call_operand.hbm [shape: bf16[128,32], index: 3, kind: output, shape index: {0}]   ;;  %s928_s4 = inlined_call_operand.hbm [shape: f32[128,4], index: 4, kind: output, shape index: {1}]   ;;  %s929_s5 = inlined_call_operand.hbm [shape: f32[4,128], index: 5, kind: output, shape index: {2}]  }
   0x1   :  { %12 = vsyncpa [#allocation6], 0 }
   0x2   :  { %13 = vsyncpa [#allocation4], 0 }
   0x3   :  { %14 = vsyncpa [#allocation10], 0  ;;  %s732_s18 = smov [#allocation5]   ;;  %s592_s22 = scalar_lea.hbm %s925_s1, 256 }
   0x4   :  { %s32_s19 = sshll.u32 %s732_s18, 4  ;;  %p593_p0 = scmp.ne.s32.totalorder %s925_s1, %s592_s22  ;;  %s33_s19 = int_to_ptr.vmem [resolvable:$true] %s32_s19 }
   0x5   :  { %p596_p1 = scmp.lt.u32.totalorder %s592_s22, %s925_s1 }
   0x7   :  { %p598_p2 = pnand %p596_p1, %p593_p0 }
   0x9   :  { %601 = shalt.err (!%p598_p2)
}
   0xa   :  { %s602_s27 = scalar_lea.vmem %s33_s19, 256  ;;  %p607_p4 = scmp.lt.s32.totalorder %s33_s19, %s33_s19 }
   0xb   :  { %p603_p3 = scmp.ne.s32.totalorder %s33_s19, %s602_s27  ;;  %p608_p5 = scmp.lt.s32.totalorder %s602_s27, %s602_s27 }
   0xd   :  { %p609_p6 = por %p608_p5, %p607_p4 }
   0xf   :  { %p610_p7 = pnand %p609_p6, %p603_p3 }
  0x11   :  { %613 = shalt.err (!%p610_p7)
}
  0x12   :  { %s733_s28 = smov 64   ;;  %s734_s29 = smov 4  }
  0x13   :  { %38 = dma.hbm_to_vmem [thread:$0]  %s925_s1, 256, %s33_s19, [#allocation6], %s733_s28, %s733_s28, %s734_s29  }
  0x14   :  { %s735_s7 = smov [#allocation2]   ;;  %s614_s11 = scalar_lea.hbm %s924_s0, 2048 }
  0x15   :  { %s20_s8 = sshll.u32 %s735_s7, 4  ;;  %p615_p8 = scmp.ne.s32.totalorder %s924_s0, %s614_s11  ;;  %s21_s8 = int_to_ptr.vmem [resolvable:$true] %s20_s8 }
  0x16   :  { %p618_p9 = scmp.lt.u32.totalorder %s614_s11, %s924_s0 }
  0x18   :  { %p620_p10 = pnand %p618_p9, %p615_p8 }
  0x1a   :  { %623 = shalt.err (!%p620_p10)
}
  0x1b   :  { %s624_s16 = scalar_lea.vmem %s21_s8, 2048  ;;  %p629_p12 = scmp.lt.s32.totalorder %s21_s8, %s21_s8 }
  0x1c   :  { %p625_p11 = scmp.ne.s32.totalorder %s21_s8, %s624_s16  ;;  %p630_p13 = scmp.lt.s32.totalorder %s624_s16, %s624_s16 }
  0x1e   :  { %p631_p0 = por %p630_p13, %p629_p12 }
  0x20   :  { %p632_p1 = pnand %p631_p0, %p625_p11 }
  0x22   :  { %635 = shalt.err (!%p632_p1)
}
  0x23   :  { %s736_s1 = smov 128   ;;  %s737_s17 = smov 8  }
  0x24   :  { %26 = dma.hbm_to_vmem [thread:$0]  %s924_s0, 2048, %s21_s8, [#allocation3], %s736_s1, %s736_s1, %s737_s17  }
  0x25   :  { %s738_s20 = smov [#allocation7]   ;;  %s636_s24 = scalar_lea.hbm %s926_s2, 32 }
  0x26   :  { %s45_s21 = sshll.u32 %s738_s20, 4  ;;  %p637_p2 = scmp.ne.s32.totalorder %s926_s2, %s636_s24  ;;  %s46_s21 = int_to_ptr.vmem [resolvable:$true] %s45_s21 }
  0x27   :  { %p640_p3 = scmp.lt.u32.totalorder %s636_s24, %s926_s2 }
  0x29   :  { %p642_p4 = pnand %p640_p3, %p637_p2 }
  0x2b   :  { %645 = shalt.err (!%p642_p4)
}
  0x2c   :  { %s646_s6 = scalar_lea.vmem %s46_s21, 32  ;;  %p651_p6 = scmp.lt.s32.totalorder %s46_s21, %s46_s21 }
  0x2d   :  { %p647_p5 = scmp.ne.s32.totalorder %s46_s21, %s646_s6  ;;  %p652_p7 = scmp.lt.s32.totalorder %s646_s6, %s646_s6 }
  0x2f   :  { %p653_p8 = por %p652_p7, %p651_p6 }
  0x31   :  { %p654_p9 = pnand %p653_p8, %p647_p5 }
  0x33   :  { %657 = shalt.err (!%p654_p9)
}
  0x34   :  { %48 = dma.hbm_to_vmem [thread:$0]  %s926_s2, 32, %s46_s21, [#allocation6]  }
  0x35   :  { %724 = dma.done.wait [#allocation3], 2048  }
  0x36   :  { %725 = vsyncadd [#allocation3], 4294965248 }
  0x37   :  { %726 = dma.done.wait [#allocation6], 288  }
  0x38   :  { %727 = vsyncadd [#allocation6], 4294967008  ;;  %v739_v0 = vmov 0.0   ;;  %vm740_vm0 = vmmov 0   ;;  %v590_v1 = vld [vmem:[#allocation5] sm:$0xff]   ;;  %v591_v2 = vld [vmem:[#allocation5 + $0x8] sm:$0xff]  }
  0x39   :  { %557 = vmatprep.subr.bf16.mxu1 %v739_v0  ;;  %573 = vmatprep.mubr.msk.bf16.mxu1 %vm740_vm0, %v739_v0  ;;  %v59_v3 = vld [vmem:[#allocation2] sm:$0xff]  ;;  %v60_v4 = vld [vmem:[#allocation2 + $0x8] sm:$0xff]  ;;  %vm99_vm1 = vcmask 261120   ;;  %v61_v6 = vld [vmem:[#allocation2 + $0x10] sm:$0xff]  ;;  %vm285_vm2 = vcmask 257024   ;;  %s741_s2 = smov 96  }
  0x3a   :  { %537 = vmatprep.subr.bf16.mxu0 %v590_v1  ;;  %v75_v5 = vpack.c.bf16 %v60_v4, %v59_v3  ;;  %v62_v7 = vld [vmem:[#allocation2 + $0x18] sm:$0xff]  ;;  %v63_v8 = vld [vmem:[#allocation2 + $0x20] sm:$0xff]  ;;  %v64_v9 = vld [vmem:[#allocation2 + $0x28] sm:$0xff]  ;;  %s742_s8 = smov [#allocation8]  }
  0x3b   :  { %538 = vmatpush3.bf16.msra.mxu0 %v590_v1  ;;  %v76_v11 = vpack.c.bf16 %v62_v7, %v61_v6  ;;  %v77_v12 = vpack.c.bf16 %v64_v9, %v63_v8  ;;  %v65_v13 = vld [vmem:[#allocation2 + $0x30] sm:$0xff]  ;;  %v66_v14 = vld [vmem:[#allocation2 + $0x38] sm:$0xff]  ;;  %v67_v16 = vld [vmem:[#allocation2 + $0x40] sm:$0xff]  ;;  %s433_s9 = sshll.u32 %s742_s8, 4  ;;  %s434_s9 = int_to_ptr.vmem [resolvable:$true] %s433_s9 }
  0x3c   :  { %539 = vmatprep.subr.bf16.mxu0 %v591_v2  ;;  %541 = vmatprep.mubr.msk.bf16.mxu0 %vm99_vm1, %v75_v5  ;;  %v101_v10 = vsel %vm99_vm1, %v75_v5, 0  ;;  %v68_v17 = vld [vmem:[#allocation2 + $0x48] sm:$0xff]  ;;  %v78_v18 = vpack.c.bf16 %v66_v14, %v65_v13  ;;  %v69_v20 = vld [vmem:[#allocation2 + $0x50] sm:$0xff]  ;;  %v70_v21 = vld [vmem:[#allocation2 + $0x58] sm:$0xff]  ;;  %s658_s10 = scalar_lea.vmem %s434_s9, 1024  ;;  %p663_p11 = scmp.lt.s32.totalorder %s434_s9, %s434_s9 }
  0x3d   :  { %558 = vmatpush3.bf16.xpose.msra.mxu1 %v101_v10  ;;  %v104_v15 = vsel %vm99_vm1, %v76_v11, 0  ;;  %v79_v19 = vpack.c.bf16 %v68_v17, %v67_v16  ;;  %v107_v22 = vsel %vm99_vm1, %v77_v12, 0  ;;  %v71_v23 = vld [vmem:[#allocation2 + $0x60] sm:$0xff]  ;;  %v72_v24 = vld [vmem:[#allocation2 + $0x68] sm:$0xff]  ;;  %v80_v25 = vpack.c.bf16 %v70_v21, %v69_v20  ;;  %v73_v27 = vld [vmem:[#allocation2 + $0x70] sm:$0xff]  ;;  %p659_p10 = scmp.ne.s32.totalorder %s434_s9, %s658_s10  ;;  %p664_p12 = scmp.lt.s32.totalorder %s658_s10, %s658_s10 }
  0x3e   :  { %559 = vmatprep.subr.bf16.mxu1 %v739_v0  ;;  %v81_v26 = vpack.c.bf16 %v72_v24, %v71_v23  ;;  %v74_v28 = vld [vmem:[#allocation2 + $0x78] sm:$0xff]  ;;  %v110_v29 = vsel %vm99_vm1, %v78_v18, 0  ;;  %v383_v35 = vld [vmem:[#allocation7] sm:$0x3] }
  0x3f   :  { %540 = vmatpush3.bf16.msra.mxu0 %v591_v2  ;;  %v82_v30 = vpack.c.bf16 %v74_v28, %v73_v27  ;;  %v113_v31 = vsel %vm99_vm1, %v79_v19, 0  ;;  %v116_v32 = vsel %vm99_vm1, %v80_v25, 0  ;;  %p665_p13 = por %p664_p12, %p663_p11 }
  0x40   :  { %v119_v33 = vsel %vm99_vm1, %v81_v26, 0 }
  0x41   :  { %v122_v34 = vsel %vm99_vm1, %v82_v30, 0  ;;  %p666_p0 = pnand %p665_p13, %p659_p10 }
  0x42   :  { %542 = vmatmul.mubr.msk.bf16.vlgmr.msra.gmra.mrb[0].mxu0 %vm99_vm1, %v76_v11 }
  0x43   :  { %545 = vmatprep.mubr.msk.bf16.mxu0 %vm99_vm1, %v77_v12 }
  0x45   :  { %560 = vmatpush3.bf16.xpose.msra.mxu1 %v104_v15 }
  0x46   :  { %561 = vmatprep.subr.bf16.mxu1 %v739_v0 }
  0x4a   :  { %546 = vmatmul.mubr.msk.bf16.gmra.mrb[4].mxu0 %vm99_vm1, %v78_v18 }
  0x4b   :  { %549 = vmatprep.mubr.msk.bf16.mxu0 %vm99_vm1, %v79_v19 }
  0x4d   :  { %562 = vmatpush3.bf16.xpose.msra.mxu1 %v107_v22 }
  0x4e   :  { %563 = vmatprep.subr.bf16.mxu1 %v739_v0 }
  0x52   :  { %550 = vmatmul.mubr.msk.bf16.gmra.mrb[8].mxu0 %vm99_vm1, %v80_v25 }
  0x53   :  { %553 = vmatprep.mubr.msk.bf16.mxu0 %vm99_vm1, %v81_v26 }
  0x55   :  { %564 = vmatpush3.bf16.xpose.msra.mxu1 %v110_v29 }
  0x56   :  { %565 = vmatprep.subr.bf16.mxu1 %v739_v0 }
  0x5a   :  { %554 = vmatmul.mubr.msk.bf16.gmra.mrb[12].mxu0 %vm99_vm1, %v82_v30 }
  0x5d   :  { %566 = vmatpush3.bf16.xpose.msra.mxu1 %v113_v31 }
  0x5e   :  { %567 = vmatprep.subr.bf16.mxu1 %v739_v0 }
  0x65   :  { %568 = vmatpush3.bf16.xpose.msra.mxu1 %v116_v32 }
  0x66   :  { %569 = vmatprep.subr.bf16.mxu1 %v739_v0 }
  0x6d   :  { %570 = vmatpush3.bf16.xpose.msra.mxu1 %v119_v33 }
  0x6e   :  { %571 = vmatprep.subr.bf16.mxu1 %v739_v0 }
  0x75   :  { %572 = vmatpush3.bf16.xpose.msra.mxu1 %v122_v34 }
  0x7c   :  { %574 = vmatmul.mubr.msk.bf16.vlgmr.msra.gmra.mrb[0].mxu1 %vm99_vm1, %v383_v35 }
 0x115   :  { %v543_v36 = vpop.f32.mrb[0].mxu0 }
 0x116   :  { %v504_v37 = vpack.c.bf16 %v543_v36, %v543_v36  ;;  %322 = vrot.lane.b32.xlu1 %v543_v36, %s741_s2  ;;  %v158_v38 = vpop.f32.mrb[1].mxu0 }
 0x117   :  { %v502_v39 = vpack.c.bf16 %v158_v38, %v158_v38  ;;  %318 = vrot.lane.b32.xlu0 %v158_v38, %s741_s2  ;;  %v544_v40 = vpop.f32.mrb[2].mxu0 }
 0x118   :  { %288 = vst.msk [vmem:[#allocation8 + $0x8] sm:$0xf] %vm285_vm2, %v504_v37  ;;  %v505_v41 = vpack.c.bf16 %v544_v40, %v544_v40  ;;  %v161_v42 = vpop.f32.mrb[3].mxu0 }
 0x119   :  { %286 = vst.msk [vmem:[#allocation8] sm:$0xf] %vm285_vm2, %v502_v39  ;;  %v503_v43 = vpack.c.bf16 %v161_v42, %v161_v42 }
 0x11a   :  { %289 = vst.msk [vmem:[#allocation8 + $0xc] sm:$0xf] %vm285_vm2, %v505_v41  ;;  %324 = vrot.lane.b32.xlu1 %v544_v40, %s741_s2 }
 0x11b   :  { %287 = vst.msk [vmem:[#allocation8 + $0x4] sm:$0xf] %vm285_vm2, %v503_v43  ;;  %320 = vrot.lane.b32.xlu0 %v161_v42, %s741_s2 }
 0x11d   :  { %v547_v44 = vpop.f32.mrb[4].mxu0 }
 0x11e   :  { %v508_v45 = vpack.c.bf16 %v547_v44, %v547_v44  ;;  %v174_v46 = vpop.f32.mrb[5].mxu0 }
 0x11f   :  { %v506_v47 = vpack.c.bf16 %v174_v46, %v174_v46  ;;  %330 = vrot.lane.b32.xlu0 %v547_v44, %s741_s2  ;;  %v548_v48 = vpop.f32.mrb[6].mxu0 }
 0x120   :  { %292 = vst.msk [vmem:[#allocation8 + $0x18] sm:$0xf] %vm285_vm2, %v508_v45  ;;  %v509_v49 = vpack.c.bf16 %v548_v48, %v548_v48  ;;  %332 = vrot.lane.b32.xlu1 %v548_v48, %s741_s2  ;;  %v177_v50 = vpop.f32.mrb[7].mxu0 }
 0x121   :  { %290 = vst.msk [vmem:[#allocation8 + $0x10] sm:$0xf] %vm285_vm2, %v506_v47  ;;  %v507_v51 = vpack.c.bf16 %v177_v50, %v177_v50 }
 0x122   :  { %293 = vst.msk [vmem:[#allocation8 + $0x1c] sm:$0xf] %vm285_vm2, %v509_v49 }
 0x123   :  { %291 = vst.msk [vmem:[#allocation8 + $0x14] sm:$0xf] %vm285_vm2, %v507_v51  ;;  %326 = vrot.lane.b32.xlu0 %v174_v46, %s741_s2 }
 0x124   :  { %328 = vrot.lane.b32.xlu1 %v177_v50, %s741_s2 }
 0x125   :  { %v551_v52 = vpop.f32.mrb[8].mxu0 }
 0x126   :  { %v512_v53 = vpack.c.bf16 %v551_v52, %v551_v52  ;;  %v190_v54 = vpop.f32.mrb[9].mxu0 }
 0x127   :  { %v510_v55 = vpack.c.bf16 %v190_v54, %v190_v54  ;;  %338 = vrot.lane.b32.xlu0 %v551_v52, %s741_s2  ;;  %v552_v56 = vpop.f32.mrb[10].mxu0 }
 0x128   :  { %296 = vst.msk [vmem:[#allocation8 + $0x28] sm:$0xf] %vm285_vm2, %v512_v53  ;;  %v513_v57 = vpack.c.bf16 %v552_v56, %v552_v56  ;;  %340 = vrot.lane.b32.xlu1 %v552_v56, %s741_s2  ;;  %v193_v58 = vpop.f32.mrb[11].mxu0 }
 0x129   :  { %294 = vst.msk [vmem:[#allocation8 + $0x20] sm:$0xf] %vm285_vm2, %v510_v55  ;;  %v511_v59 = vpack.c.bf16 %v193_v58, %v193_v58 }
 0x12a   :  { %297 = vst.msk [vmem:[#allocation8 + $0x2c] sm:$0xf] %vm285_vm2, %v513_v57 }
 0x12b   :  { %295 = vst.msk [vmem:[#allocation8 + $0x24] sm:$0xf] %vm285_vm2, %v511_v59  ;;  %334 = vrot.lane.b32.xlu0 %v190_v54, %s741_s2 }
 0x12c   :  { %336 = vrot.lane.b32.xlu1 %v193_v58, %s741_s2 }
 0x12d   :  { %v555_v60 = vpop.f32.mrb[12].mxu0 }
 0x12e   :  { %v516_v61 = vpack.c.bf16 %v555_v60, %v555_v60  ;;  %v206_v62 = vpop.f32.mrb[13].mxu0 }
 0x12f   :  { %v514_v63 = vpack.c.bf16 %v206_v62, %v206_v62  ;;  %342 = vrot.lane.b32.xlu0 %v206_v62, %s741_s2  ;;  %v556_v0 = vpop.f32.mrb[14].mxu0 }
 0x130   :  { %300 = vst.msk [vmem:[#allocation8 + $0x38] sm:$0xf] %vm285_vm2, %v516_v61  ;;  %v517_v1 = vpack.c.bf16 %v556_v0, %v556_v0  ;;  %v209_v2 = vpop.f32.mrb[15].mxu0 }
 0x131   :  { %298 = vst.msk [vmem:[#allocation8 + $0x30] sm:$0xf] %vm285_vm2, %v514_v63  ;;  %v515_v3 = vpack.c.bf16 %v209_v2, %v209_v2  ;;  %344 = vrot.lane.b32.xlu1 %v209_v2, %s741_s2 }
 0x132   :  { %301 = vst.msk [vmem:[#allocation8 + $0x3c] sm:$0xf] %vm285_vm2, %v517_v1 }
 0x133   :  { %299 = vst.msk [vmem:[#allocation8 + $0x34] sm:$0xf] %vm285_vm2, %v515_v3  ;;  %346 = vrot.lane.b32.xlu0 %v555_v60, %s741_s2 }
 0x134   :  { %669 = shalt.err (!%p666_p0)
}
 0x135   :  { %s670_s13 = scalar_lea.hbm %s927_s3, 1024 }
 0x136   :  { %p671_p1 = scmp.ne.s32.totalorder %s927_s3, %s670_s13  ;;  %p674_p2 = scmp.lt.u32.totalorder %s670_s13, %s927_s3 }
 0x138   :  { %p676_p3 = pnand %p674_p2, %p671_p1 }
 0x13a   :  { %679 = shalt.err (!%p676_p3)
}
 0x13b   :  { %439 = dma.vmem_to_hbm [thread:$0]  %s434_s9, 1024, %s927_s3, [#allocation4], %s733_s28, %s733_s28, %s734_s29   ;;  %vm366_vm3 = vcmask 31744  }
 0x13c   :  { %348 = vrot.lane.b32.xlu1 %v556_v0, %s741_s2  ;;  %s743_s3 = smov [#allocation9]   ;;  %s744_s29 = smov [#allocation11]  }
 0x13d   :  { %s445_s28 = sshll.u32 %s743_s3, 4  ;;  %s458_s21 = sshll.u32 %s744_s29, 4  ;;  %s446_s28 = int_to_ptr.vmem [resolvable:$true] %s445_s28  ;;  %s459_s21 = int_to_ptr.vmem [resolvable:$true] %s458_s21 }
 0x13e   :  { %s680_s22 = scalar_lea.vmem %s446_s28, 2048  ;;  %p685_p5 = scmp.lt.s32.totalorder %s446_s28, %s446_s28 }
 0x13f   :  { %p681_p4 = scmp.ne.s32.totalorder %s446_s28, %s680_s22  ;;  %p686_p6 = scmp.lt.s32.totalorder %s680_s22, %s680_s22 }
 0x141   :  { %p687_p7 = por %p686_p6, %p685_p5 }
 0x143   :  { %p688_p8 = pnand %p687_p7, %p681_p4 }
 0x14f   :  { %v421_v4 = vpop.f32.mrb[0].mxu1 }
 0x150   :  { %427 = vst [vmem:[#allocation11] sm:$0xf] %v421_v4  ;;  %v575_v5 = vpop.f32.mrb[1].mxu1 }
 0x151   :  { %v424_v6 = vpop.f32.mrb[2].mxu1 }
 0x152   :  { %v576_v7 = vpop.f32.mrb[3].mxu1 }
 0x188   :  { %v323_v8 = vpop.permute.xlu1 %322 }
 0x189   :  { %369 = vst.msk [vmem:[#allocation9 + $0x10] sm:$0xff] %vm366_vm3, %v323_v8  ;;  %v319_v9 = vpop.permute.xlu0 %318 }
 0x18a   :  { %367 = vst.msk [vmem:[#allocation9] sm:$0xff] %vm366_vm3, %v319_v9 }
 0x18c   :  { %v325_v10 = vpop.permute.xlu1 %324 }
 0x18d   :  { %370 = vst.msk [vmem:[#allocation9 + $0x18] sm:$0xff] %vm366_vm3, %v325_v10  ;;  %v321_v11 = vpop.permute.xlu0 %320 }
 0x18e   :  { %368 = vst.msk [vmem:[#allocation9 + $0x8] sm:$0xff] %vm366_vm3, %v321_v11 }
 0x191   :  { %v331_v12 = vpop.permute.xlu0 %330 }
 0x192   :  { %373 = vst.msk [vmem:[#allocation9 + $0x30] sm:$0xff] %vm366_vm3, %v331_v12  ;;  %v333_v13 = vpop.permute.xlu1 %332 }
 0x193   :  { %374 = vst.msk [vmem:[#allocation9 + $0x38] sm:$0xff] %vm366_vm3, %v333_v13 }
 0x195   :  { %v327_v14 = vpop.permute.xlu0 %326 }
 0x196   :  { %371 = vst.msk [vmem:[#allocation9 + $0x20] sm:$0xff] %vm366_vm3, %v327_v14  ;;  %v329_v15 = vpop.permute.xlu1 %328 }
 0x197   :  { %372 = vst.msk [vmem:[#allocation9 + $0x28] sm:$0xff] %vm366_vm3, %v329_v15 }
 0x199   :  { %v339_v16 = vpop.permute.xlu0 %338 }
 0x19a   :  { %377 = vst.msk [vmem:[#allocation9 + $0x50] sm:$0xff] %vm366_vm3, %v339_v16  ;;  %v341_v17 = vpop.permute.xlu1 %340 }
 0x19b   :  { %378 = vst.msk [vmem:[#allocation9 + $0x58] sm:$0xff] %vm366_vm3, %v341_v17 }
 0x19d   :  { %v335_v18 = vpop.permute.xlu0 %334 }
 0x19e   :  { %375 = vst.msk [vmem:[#allocation9 + $0x40] sm:$0xff] %vm366_vm3, %v335_v18  ;;  %v337_v19 = vpop.permute.xlu1 %336 }
 0x19f   :  { %376 = vst.msk [vmem:[#allocation9 + $0x48] sm:$0xff] %vm366_vm3, %v337_v19 }
 0x1a1   :  { %v343_v20 = vpop.permute.xlu0 %342 }
 0x1a2   :  { %379 = vst.msk [vmem:[#allocation9 + $0x60] sm:$0xff] %vm366_vm3, %v343_v20 }
 0x1a3   :  { %v345_v21 = vpop.permute.xlu1 %344 }
 0x1a4   :  { %380 = vst.msk [vmem:[#allocation9 + $0x68] sm:$0xff] %vm366_vm3, %v345_v21 }
 0x1a5   :  { %v347_v22 = vpop.permute.xlu0 %346 }
 0x1a6   :  { %381 = vst.msk [vmem:[#allocation9 + $0x70] sm:$0xff] %vm366_vm3, %v347_v22 }
 0x1ae   :  { %v349_v23 = vpop.permute.xlu1 %348 }
 0x1af   :  { %382 = vst.msk [vmem:[#allocation9 + $0x78] sm:$0xff] %vm366_vm3, %v349_v23 }
 0x1b0   :  { %691 = shalt.err (!%p688_p8)
}
 0x1b1   :  { %s692_s25 = scalar_lea.hbm %s928_s4, 2048 }
 0x1b2   :  { %p693_p9 = scmp.ne.s32.totalorder %s928_s4, %s692_s25  ;;  %p696_p10 = scmp.lt.u32.totalorder %s692_s25, %s928_s4 }
 0x1b4   :  { %p698_p11 = pnand %p696_p10, %p693_p9 }
 0x1b6   :  { %701 = shalt.err (!%p698_p11)
}
 0x1b7   :  { %451 = dma.vmem_to_hbm [thread:$0]  %s446_s28, 2048, %s928_s4, [#allocation10], %s736_s1, %s736_s1, %s737_s17  }
 0x1b8   :  { %s702_s2 = scalar_lea.vmem %s459_s21, 64  ;;  %p707_p13 = scmp.lt.s32.totalorder %s459_s21, %s459_s21 }
 0x1b9   :  { %p703_p12 = scmp.ne.s32.totalorder %s459_s21, %s702_s2  ;;  %p708_p0 = scmp.lt.s32.totalorder %s702_s2, %s702_s2 }
 0x1bb   :  { %p709_p1 = por %p708_p0, %p707_p13 }
 0x1bd   :  { %p710_p2 = pnand %p709_p1, %p703_p12 }
 0x1bf   :  { %713 = shalt.err (!%p710_p2)
}
 0x1c0   :  { %s714_s10 = scalar_lea.hbm %s929_s5, 64 }
 0x1c1   :  { %p715_p3 = scmp.ne.s32.totalorder %s929_s5, %s714_s10  ;;  %p718_p4 = scmp.lt.u32.totalorder %s714_s10, %s929_s5 }
 0x1c3   :  { %p720_p5 = pnand %p718_p4, %p715_p3 }
 0x1c5   :  { %723 = shalt.err (!%p720_p5)
}
 0x1c6   :  { %461 = dma.vmem_to_hbm [thread:$0]  %s459_s21, 64, %s929_s5, [#allocation10]  }
 0x1c7   :  { %728 = dma.done.wait [#allocation4], 1024  }
 0x1c8   :  { %729 = vsyncadd [#allocation4], 4294966272 }
 0x1c9   :  { %730 = dma.done.wait [#allocation10], 2112  }
 0x1ca   :  { %731 = vsyncadd [#allocation10], 4294965184 }
 0x1cb   :  { %471 = vsyncpa [#allocation3], 1 }
 0x1cc   :  { %472 = vsyncpa [#allocation6], 1 }
 0x1cd   :  { %473 = vsyncpa [#allocation4], 1 }
 0x1ce   :  { %474 = vsyncpa [#allocation10], 1 }

</bundles_post_ra>
